<compile_context>
chip_gen: v6e
topology: v6e:2x2x1
jax: 0.10.0
libtpu: 0.0.40
codegen_flags: <defaults>
</compile_context>

<pallas_src>
import functools

import jax
import jax.numpy as jnp
from jax.experimental import pallas as pl
from jax.experimental.pallas import tpu as pltpu

NUM_CLASSES = 7
IN_CH = 8
BN_EPS = 1e-5
DEFAULT_BLOCK_B = 8192   # batch tile (sweepable; keep grid >= 2 for large B on v7x)


def _cdiv(a, b):
    return -(-a // b)


def _round_up(n, m):
    return (n + m - 1) // m * m


# ---------------------------------------------------------------------------
# Kernel
# ---------------------------------------------------------------------------
def emgcnn_kernel(x_ref, w1_ref, w2_ref, w3_ref, wfc_ref, bias_ref, out_ref):
    # x tile: (TB, 8) f32 -> cast to bf16 in-kernel (MXU operand).
    # Weights: bf16 with eval-mode BN scale folded in.  bias_ref: (4, 64) f32,
    # row 0 = b1[:16], row 1 = b2[:32], row 2 = b3[:64], row 3 = bfc[:7].
    x = x_ref[...].astype(jnp.bfloat16)

    # conv1 (1x1) + folded BN1 + ReLU   (MaxPool1d(1) is the identity)
    h = jnp.dot(x, w1_ref[...], preferred_element_type=jnp.float32)          # (TB, 16)
    h = jnp.maximum(h + bias_ref[0:1, :16], 0.0)

    # conv2 (1x1) + folded BN2 + ReLU
    h = jnp.dot(h.astype(jnp.bfloat16), w2_ref[...],
                preferred_element_type=jnp.float32)                          # (TB, 32)
    h = jnp.maximum(h + bias_ref[1:2, :32], 0.0)

    # conv3 (1x1) + folded BN3 + ReLU
    h = jnp.dot(h.astype(jnp.bfloat16), w3_ref[...],
                preferred_element_type=jnp.float32)                          # (TB, 64)
    h = jnp.maximum(h + bias_ref[2:3, :64], 0.0)

    # fc + softmax over the 7 real classes only.
    logits = jnp.dot(h.astype(jnp.bfloat16), wfc_ref[...],
                     preferred_element_type=jnp.float32)                     # (TB, 7)
    logits = logits + bias_ref[3:4, :NUM_CLASSES]
    m = jnp.max(logits, axis=1, keepdims=True)
    e = jnp.exp(logits - m)
    out_ref[...] = (e / jnp.sum(e, axis=1, keepdims=True)).astype(out_ref.dtype)


# ---------------------------------------------------------------------------
# Wrapper
# ---------------------------------------------------------------------------
@functools.partial(jax.jit, static_argnames=("block_b",))
def emgcnn_forward(x_ncl, kparams, block_b=DEFAULT_BLOCK_B):
    """x_ncl: (B, 8, 1) float32 -> (B, 7) softmax probabilities."""
    B = x_ncl.shape[0]
    w1, w2, w3, wfc, biases = kparams

    x2d = x_ncl.reshape(B, IN_CH)                 # f32; bf16 cast happens in-kernel

    # Split the batch into near-equal tiles, each a multiple of 8 rows.
    n_tiles = max(1, _cdiv(B, block_b))
    tb = _round_up(_cdiv(B, n_tiles), 8)
    b_pad = n_tiles * tb
    if b_pad != B:
        x2d = jnp.pad(x2d, ((0, b_pad - B), (0, 0)))   # at most a few rows per tile

    def const_spec(arr):
        # full-array block, constant index -> DMA'd once, resident across grid steps
        return pl.BlockSpec(arr.shape, lambda i: (0, 0))

    weight_bytes = sum(int(a.size) * a.dtype.itemsize
                       for a in (w1, w2, w3, wfc, biases))
    cost = pl.CostEstimate(
        flops=2 * b_pad * (IN_CH * 16 + 16 * 32 + 32 * 64 + 64 * NUM_CLASSES),
        transcendentals=b_pad * NUM_CLASSES,
        bytes_accessed=b_pad * IN_CH * 4 + b_pad * NUM_CLASSES * 4 + weight_bytes,
    )

    out_pad = pl.pallas_call(
        emgcnn_kernel,
        out_shape=jax.ShapeDtypeStruct((b_pad, NUM_CLASSES), jnp.float32),
        grid=(n_tiles,),
        in_specs=[
            pl.BlockSpec((tb, IN_CH), lambda i: (i, 0)),   # x tile, pipelined over batch
            const_spec(w1), const_spec(w2), const_spec(w3),
            const_spec(wfc), const_spec(biases),
        ],
        out_specs=pl.BlockSpec((tb, NUM_CLASSES), lambda i: (i, 0)),
        compiler_params=pltpu.CompilerParams(
            dimension_semantics=("parallel",),             # megacore sharding on v7x
        ),
        cost_estimate=cost,
    )(x2d, w1, w2, w3, wfc, biases)

    return out_pad[:B] if b_pad != B else out_pad


# ---------------------------------------------------------------------------
# Parameter preparation
# ---------------------------------------------------------------------------
def fold_conv_bn(w, cb, gamma, beta, rmean, rvar):
    """Fold Conv1d(k=1) bias + eval-mode BatchNorm1d into (W folded, bias).

    conv: z = x @ W^T + cb ;  bn: (z - rmean) * gamma/sqrt(rvar+eps) + beta.
    The BN scale commutes with the matmul, so it is baked into the weights.
    """
    s = gamma / jnp.sqrt(rvar + BN_EPS)                    # (Cout,)
    w_folded = (w * s[:, None]).T                          # (Cin, Cout)
    b = s * (cb - rmean) + beta                            # (Cout,)
    return w_folded.astype(jnp.float32), b[None, :].astype(jnp.float32)


def init_params(key):
    """Deterministic f32 parameters matching the PyTorch module's shapes (BN folded)."""
    def conv_block(key, cin, cout):
        k = jax.random.split(key, 6)
        bound = 1.0 / jnp.sqrt(cin)
        w = jax.random.uniform(k[0], (cout, cin), jnp.float32, -bound, bound)
        cb = jax.random.uniform(k[1], (cout,), jnp.float32, -bound, bound)
        gamma = 1.0 + 0.1 * jax.random.normal(k[2], (cout,), jnp.float32)
        beta = 0.1 * jax.random.normal(k[3], (cout,), jnp.float32)
        rmean = 0.1 * jax.random.normal(k[4], (cout,), jnp.float32)
        rvar = 1.0 + 0.1 * jax.random.uniform(k[5], (cout,), jnp.float32)
        return fold_conv_bn(w, cb, gamma, beta, rmean, rvar)

    k1, k2, k3, k4, k5 = jax.random.split(key, 5)
    blk1 = conv_block(k1, IN_CH, 16)
    blk2 = conv_block(k2, 16, 32)
    blk3 = conv_block(k3, 32, 64)
    bound = 1.0 / jnp.sqrt(64.0)
    wfc = jax.random.uniform(k4, (NUM_CLASSES, 64), jnp.float32, -bound, bound)
    bfc = jax.random.uniform(k5, (NUM_CLASSES,), jnp.float32, -bound, bound)
    return blk1, blk2, blk3, (wfc.T.astype(jnp.float32), bfc[None, :].astype(jnp.float32))


def prep_kernel_params(params):
    """bf16 matmul weights + one merged resident (4, 64) f32 bias operand."""
    (w1, b1), (w2, b2), (w3, b3), (wfc, bfc) = params
    biases = jnp.zeros((4, 64), jnp.float32)
    biases = biases.at[0, :16].set(b1.reshape(-1))
    biases = biases.at[1, :32].set(b2.reshape(-1))
    biases = biases.at[2, :64].set(b3.reshape(-1))
    biases = biases.at[3, :NUM_CLASSES].set(bfc.reshape(-1))
    return (w1.astype(jnp.bfloat16), w2.astype(jnp.bfloat16),
            w3.astype(jnp.bfloat16), wfc.astype(jnp.bfloat16), biases)


# ---------------------------------------------------------------------------
# Plain-JAX references
# ---------------------------------------------------------------------------
def reference_forward_f32(x_ncl, params):
    """Exact f32 math of the original module (BN folded, eval mode)."""
    B = x_ncl.shape[0]
    h = x_ncl.reshape(B, IN_CH)
    (w1, b1), (w2, b2), (w3, b3), (wfc, bfc) = params
    h = jnp.maximum(h @ w1 + b1, 0.0)
    h = jnp.maximum(h @ w2 + b2, 0.0)
    h = jnp.maximum(h @ w3 + b3, 0.0)
    return jax.nn.softmax(h @ wfc + bfc, axis=1)


def reference_forward_bf16(x_ncl, params):
    """Same math as the kernel: bf16 matmul operands, f32 accum / elementwise."""
    B = x_ncl.shape[0]
    (w1, b1), (w2, b2), (w3, b3), (wfc, bfc) = params

    def dot(a, w):
        return jnp.dot(a.astype(jnp.bfloat16), w.astype(jnp.bfloat16),
                       preferred_element_type=jnp.float32)

    h = x_ncl.reshape(B, IN_CH)
    h = jnp.maximum(dot(h, w1) + b1, 0.0)
    h = jnp.maximum(dot(h, w2) + b2, 0.0)
    h = jnp.maximum(dot(h, w3) + b3, 0.0)
    return jax.nn.softmax(dot(h, wfc) + bfc, axis=1)


if __name__ == "__main__":
    key = jax.random.PRNGKey(0)
    kx, kp = jax.random.split(key)
    B = 8
    x = jax.random.normal(kx, (B, IN_CH, 1), jnp.float32)   # NCL layout, L = 1
    params = init_params(kp)
    kparams = prep_kernel_params(params)

    out = jax.block_until_ready(emgcnn_forward(x, kparams))

    ref_bf16 = reference_forward_bf16(x, params)
    ref_f32 = reference_forward_f32(x, params)

    assert out.shape == (B, NUM_CLASSES)
    assert bool(jnp.all(jnp.isfinite(out)))
    # tight check vs. a reference using the same bf16-operand matmuls
    assert jnp.allclose(out, ref_bf16, atol=1e-4, rtol=1e-4), \
        float(jnp.max(jnp.abs(out - ref_bf16)))
    # loose check vs. the exact f32 module math (bf16 weight-rounding tolerance)
    assert jnp.allclose(out, ref_f32, atol=3e-2, rtol=3e-2), \
        float(jnp.max(jnp.abs(out - ref_f32)))
    # probabilities sum to 1 (exact divide -> f32 precision)
    assert jnp.allclose(jnp.sum(out, axis=1), 1.0, atol=1e-5)
    print("KERNEL_OK")
</pallas_src>

<mosaic_0001>
module attributes {stable_mosaic.version = 11 : i64} {
  func.func @emgcnn_kernel(%arg0: i32, %arg1: memref<8x8xf32, #tpu.memory_space<vmem>>, %arg2: memref<8x16xbf16, #tpu.memory_space<vmem>>, %arg3: memref<16x32xbf16, #tpu.memory_space<vmem>>, %arg4: memref<32x64xbf16, #tpu.memory_space<vmem>>, %arg5: memref<64x7xbf16, #tpu.memory_space<vmem>>, %arg6: memref<4x64xf32, #tpu.memory_space<vmem>>, %arg7: memref<8x7xf32, #tpu.memory_space<vmem>>) attributes {dimension_semantics = [#tpu.dimension_semantics<parallel>], iteration_bounds = array<i64: 1>, scalar_prefetch = 0 : i64, scratch_operands = 0 : i64, tpu.core_type = #tpu.core_type<tc>, window_params = [{transform_indices = @transform_0, window_bounds = array<i64: 8, 8>}, {pipeline_mode = #tpu.pipeline_mode<synchronous>, transform_indices = @transform_1, window_bounds = array<i64: 8, 16>}, {pipeline_mode = #tpu.pipeline_mode<synchronous>, transform_indices = @transform_2, window_bounds = array<i64: 16, 32>}, {pipeline_mode = #tpu.pipeline_mode<synchronous>, transform_indices = @transform_3, window_bounds = array<i64: 32, 64>}, {pipeline_mode = #tpu.pipeline_mode<synchronous>, transform_indices = @transform_4, window_bounds = array<i64: 64, 7>}, {pipeline_mode = #tpu.pipeline_mode<synchronous>, transform_indices = @transform_5, window_bounds = array<i64: 4, 64>}, {transform_indices = @transform_6, window_bounds = array<i64: 8, 7>}]} {
    %c0 = arith.constant 0 : index
    %c0_0 = arith.constant 0 : index
    %0 = vector.load %arg1[%c0, %c0_0] : memref<8x8xf32, #tpu.memory_space<vmem>>, vector<8x8xf32>
    %1 = arith.truncf %0 : vector<8x8xf32> to vector<8x8xbf16>
    %c0_1 = arith.constant 0 : index
    %c0_2 = arith.constant 0 : index
    %2 = vector.load %arg2[%c0_1, %c0_2] : memref<8x16xbf16, #tpu.memory_space<vmem>>, vector<8x16xbf16>
    %cst = arith.constant dense<0.000000e+00> : vector<8x16xf32>
    %3 = tpu.matmul %1, %2, %cst {dimension_numbers = #tpu.dot_dimension_numbers<[1], [0], [0], [1], [0, 0, 1, 1], [], []>} : vector<8x8xbf16>, vector<8x16xbf16>, vector<8x16xf32> -> vector<8x16xf32>
    %c0_3 = arith.constant 0 : index
    %c0_4 = arith.constant 0 : index
    %4 = vector.load %arg6[%c0_3, %c0_4] : memref<4x64xf32, #tpu.memory_space<vmem>>, vector<1x16xf32>
    %5 = vector.broadcast %4 : vector<1x16xf32> to vector<8x16xf32>
    %6 = arith.addf %3, %5 : vector<8x16xf32>
    %cst_5 = arith.constant 0.000000e+00 : f32
    %7 = vector.broadcast %cst_5 : f32 to vector<8x16xf32>
    %8 = arith.maximumf %6, %7 : vector<8x16xf32>
    %9 = arith.truncf %8 : vector<8x16xf32> to vector<8x16xbf16>
    %c0_6 = arith.constant 0 : index
    %c0_7 = arith.constant 0 : index
    %10 = vector.load %arg3[%c0_6, %c0_7] : memref<16x32xbf16, #tpu.memory_space<vmem>>, vector<16x32xbf16>
    %cst_8 = arith.constant dense<0.000000e+00> : vector<8x32xf32>
    %11 = tpu.matmul %9, %10, %cst_8 {dimension_numbers = #tpu.dot_dimension_numbers<[1], [0], [0], [1], [0, 0, 1, 1], [], []>} : vector<8x16xbf16>, vector<16x32xbf16>, vector<8x32xf32> -> vector<8x32xf32>
    %c1 = arith.constant 1 : index
    %c0_9 = arith.constant 0 : index
    %12 = vector.load %arg6[%c1, %c0_9] : memref<4x64xf32, #tpu.memory_space<vmem>>, vector<1x32xf32>
    %13 = vector.broadcast %12 : vector<1x32xf32> to vector<8x32xf32>
    %14 = arith.addf %11, %13 : vector<8x32xf32>
    %cst_10 = arith.constant 0.000000e+00 : f32
    %15 = vector.broadcast %cst_10 : f32 to vector<8x32xf32>
    %16 = arith.maximumf %14, %15 : vector<8x32xf32>
    %17 = arith.truncf %16 : vector<8x32xf32> to vector<8x32xbf16>
    %c0_11 = arith.constant 0 : index
    %c0_12 = arith.constant 0 : index
    %18 = vector.load %arg4[%c0_11, %c0_12] : memref<32x64xbf16, #tpu.memory_space<vmem>>, vector<32x64xbf16>
    %cst_13 = arith.constant dense<0.000000e+00> : vector<8x64xf32>
    %19 = tpu.matmul %17, %18, %cst_13 {dimension_numbers = #tpu.dot_dimension_numbers<[1], [0], [0], [1], [0, 0, 1, 1], [], []>} : vector<8x32xbf16>, vector<32x64xbf16>, vector<8x64xf32> -> vector<8x64xf32>
    %c2 = arith.constant 2 : index
    %c0_14 = arith.constant 0 : index
    %20 = vector.load %arg6[%c2, %c0_14] : memref<4x64xf32, #tpu.memory_space<vmem>>, vector<1x64xf32>
    %21 = vector.broadcast %20 : vector<1x64xf32> to vector<8x64xf32>
    %22 = arith.addf %19, %21 : vector<8x64xf32>
    %cst_15 = arith.constant 0.000000e+00 : f32
    %23 = vector.broadcast %cst_15 : f32 to vector<8x64xf32>
    %24 = arith.maximumf %22, %23 : vector<8x64xf32>
    %25 = arith.truncf %24 : vector<8x64xf32> to vector<8x64xbf16>
    %c0_16 = arith.constant 0 : index
    %c0_17 = arith.constant 0 : index
    %26 = vector.load %arg5[%c0_16, %c0_17] : memref<64x7xbf16, #tpu.memory_space<vmem>>, vector<64x7xbf16>
    %cst_18 = arith.constant dense<0.000000e+00> : vector<8x7xf32>
    %27 = tpu.matmul %25, %26, %cst_18 {dimension_numbers = #tpu.dot_dimension_numbers<[1], [0], [0], [1], [0, 0, 1, 1], [], []>} : vector<8x64xbf16>, vector<64x7xbf16>, vector<8x7xf32> -> vector<8x7xf32>
    %c3 = arith.constant 3 : index
    %c0_19 = arith.constant 0 : index
    %28 = vector.load %arg6[%c3, %c0_19] : memref<4x64xf32, #tpu.memory_space<vmem>>, vector<1x7xf32>
    %29 = vector.broadcast %28 : vector<1x7xf32> to vector<8x7xf32>
    %30 = arith.addf %27, %29 : vector<8x7xf32>
    %cst_20 = arith.constant dense<0xFF800000> : vector<8xf32>
    %31 = vector.multi_reduction <maximumf>, %30, %cst_20 [1] : vector<8x7xf32> to vector<8xf32>
    %32 = vector.shape_cast %31 : vector<8xf32> to vector<8x1xf32>
    %33 = vector.broadcast %32 : vector<8x1xf32> to vector<8x7xf32>
    %34 = arith.subf %30, %33 : vector<8x7xf32>
    %35 = math.exp %34 : vector<8x7xf32>
    %cst_21 = arith.constant dense<0.000000e+00> : vector<8xf32>
    %36 = vector.multi_reduction <add>, %35, %cst_21 [1] : vector<8x7xf32> to vector<8xf32>
    %37 = vector.shape_cast %36 : vector<8xf32> to vector<8x1xf32>
    %38 = vector.broadcast %37 : vector<8x1xf32> to vector<8x7xf32>
    %39 = arith.divf %35, %38 : vector<8x7xf32>
    %c0_22 = arith.constant 0 : index
    %c0_23 = arith.constant 0 : index
    %40 = vector.load %arg7[%c0_22, %c0_23] : memref<8x7xf32, #tpu.memory_space<vmem>>, vector<8x7xf32>
    tpu.vector_store %arg7[%c0_22, %c0_23], %39 {strides = array<i32>} : memref<8x7xf32, #tpu.memory_space<vmem>>, vector<8x7xf32>,
    return
  }
  func.func @transform_0(%arg0: i32) -> (i32, i32) {
    %c0_i32 = arith.constant 0 : i32
    %c0_i32_0 = arith.constant 0 : i32
    return %arg0, %c0_i32 : i32, i32
  }
  func.func @transform_1(%arg0: i32) -> (i32, i32) {
    %c0_i32 = arith.constant 0 : i32
    %c0_i32_0 = arith.constant 0 : i32
    %c0_i32_1 = arith.constant 0 : i32
    return %c0_i32, %c0_i32_0 : i32, i32
  }
  func.func @transform_2(%arg0: i32) -> (i32, i32) {
    %c0_i32 = arith.constant 0 : i32
    %c0_i32_0 = arith.constant 0 : i32
    %c0_i32_1 = arith.constant 0 : i32
    return %c0_i32, %c0_i32_0 : i32, i32
  }
  func.func @transform_3(%arg0: i32) -> (i32, i32) {
    %c0_i32 = arith.constant 0 : i32
    %c0_i32_0 = arith.constant 0 : i32
    %c0_i32_1 = arith.constant 0 : i32
    return %c0_i32, %c0_i32_0 : i32, i32
  }
  func.func @transform_4(%arg0: i32) -> (i32, i32) {
    %c0_i32 = arith.constant 0 : i32
    %c0_i32_0 = arith.constant 0 : i32
    %c0_i32_1 = arith.constant 0 : i32
    return %c0_i32, %c0_i32_0 : i32, i32
  }
  func.func @transform_5(%arg0: i32) -> (i32, i32) {
    %c0_i32 = arith.constant 0 : i32
    %c0_i32_0 = arith.constant 0 : i32
    %c0_i32_1 = arith.constant 0 : i32
    return %c0_i32, %c0_i32_0 : i32, i32
  }
  func.func @transform_6(%arg0: i32) -> (i32, i32) {
    %c0_i32 = arith.constant 0 : i32
    %c0_i32_0 = arith.constant 0 : i32
    return %arg0, %c0_i32 : i32, i32
  }
}

</mosaic_0001>

<bundles_post_ra>
// kernel: emgcnn_forward.1
= control target key start
LH: loop header
LB: loop body
LE: loop exit
PB: predicated region body
PF: predicated region fallthrough
CT: control target
= control target key end

     0   :  { %vm37_vm0 = vcmask 1043456   ;;  %v412_v2 = vmov 0.0   ;;  %vm413_vm1 = vmmov 0   ;;  %vm33_vm2 = vcmask 64512   ;;  %s499_s0 = inlined_call_operand.vmem [shape: f32[8,8], index: 0, kind: input, shape index: {}]   ;;  %s500_s1 = inlined_call_operand.vmem [shape: bf16[8,16], index: 1, kind: input, shape index: {}]   ;;  %s501_s2 = inlined_call_operand.vmem [shape: bf16[16,32], index: 2, kind: input, shape index: {}]   ;;  %s502_s3 = inlined_call_operand.vmem [shape: bf16[32,64], index: 3, kind: input, shape index: {}]   ;;  %s503_s4 = inlined_call_operand.vmem [shape: bf16[64,7], index: 4, kind: input, shape index: {}]   ;;  %s504_s5 = inlined_call_operand.vmem [shape: f32[4,64], index: 5, kind: input, shape index: {}]   ;;  %s505_s6 = inlined_call_operand.hbm [shape: f32[8,7], index: 6, kind: output, shape index: {}]  }
   0x1   :  { %v27_v0 = vld [vmem:[%s500_s1] sm:$0xf]  ;;  %344 = vmatprep.subr.bf16.mxu0 %v412_v2  ;;  %346 = vmatprep.mubr.msk.bf16.mxu0 %vm413_vm1, %v412_v2 }
   0x2   :  { %v25_v1 = vld [vmem:[%s499_s0] sm:$0xff]  ;;  %v39_v3 = vsel %vm37_vm0, %v27_v0, 0  ;;  %350 = vmatprep.subr.bf16.mxu1 %v412_v2  ;;  %352 = vmatprep.mubr.msk.bf16.mxu1 %vm413_vm1, %v412_v2 }
   0x3   :  { %v26_v4 = vpack.c.bf16 %v25_v1, %v25_v1  ;;  %345 = vmatpush3.bf16.msra.mxu0 %v39_v3 }
   0x4   :  { %356 = vmatprep.subr.bf16.mxu0 %v412_v2 }
   0x6   :  { %347 = vmatmul.mubr.msk.bf16.vlgmr.msra.gmra.mxu0 %vm33_vm2, %v26_v4 }
   0x7   :  { %360 = vmatprep.mubr.msk.bf16.mxu0 %vm413_vm1, %v412_v2 }
   0x8   :  { %11 = vsyncpa [#allocation3], 0  ;;  %v379_v5 = vld [vmem:[%s501_s2] sm:$0xff]   ;;  %v380_v6 = vld [vmem:[%s502_s3 + $0x8] sm:$0xff]   ;;  %vm96_vm3 = vcmask 130048   ;;  %vm163_vm4 = vcmask 261120  }
   0x9   :  { %351 = vmatpush3.bf16.msra.mxu1 %v379_v5  ;;  %357 = vmatpush3.bf16.msra.mxu0 %v380_v6  ;;  %v317_v7 = vld [vmem:[%s504_s5] ss:$0 sm:$0xff]  ;;  %v382_v16 = vld [vmem:[%s503_s4 + $0x18] sm:$0xff]   ;;  %v383_v17 = vld [vmem:[%s503_s4 + $0x10] sm:$0xff]   ;;  %vm246_vm5 = vcmask 523264   ;;  %vm290_vm6 = vcmask 56320  }
   0xa   :  { %364 = vmatprep.subr.bf16.mxu1 %v412_v2  ;;  %358 = vmatprep.subr.bf16.mxu0 %v412_v2  ;;  %v381_v15 = vld [vmem:[%s502_s3] sm:$0xff]   ;;  %v384_v26 = vld [vmem:[%s503_s4 + $0x8] sm:$0xff]  }
   0xb   :  { %v319_v18 = vld [vmem:[%s504_s5 + $0x1] ss:$0 sm:$0xff]  ;;  %v322_v28 = vld [vmem:[%s504_s5 + $0x2] ss:$0 sm:$0xff]  ;;  %v326_v36 = vld [vmem:[%s504_s5 + $0x3] ss:$0 sm:$0xff] }
   0xc   :  { %v385_v27 = vld [vmem:[%s503_s4] sm:$0xff]   ;;  %s414_s4 = smov [#allocation2]  }
   0xd   :  { %359 = vmatpush3.bf16.msra.mxu0 %v381_v15  ;;  %s309_s5 = sshll.u32 %s414_s4, 4  ;;  %s310_s5 = int_to_ptr.vmem [resolvable:$true] %s309_s5 }
   0xe   :  { %s390_s19 = scalar_lea.vmem %s310_s5, 128  ;;  %p395_p1 = scmp.lt.s32.totalorder %s310_s5, %s310_s5 }
   0xf   :  { %p391_p0 = scmp.ne.s32.totalorder %s310_s5, %s390_s19  ;;  %p396_p2 = scmp.lt.s32.totalorder %s390_s19, %s390_s19 }
  0x11   :  { %p397_p3 = por %p396_p2, %p395_p1 }
  0x13   :  { %p398_p4 = pnand %p397_p3, %p391_p0 }
  0xc6   :  { %v75_v8 = vpop.f32.mrf.mxu0 }
  0xc7   :  { %v76_v9 = vadd.f32 %v317_v7, %v75_v8 }
  0xc8   :  { %v348_v10 = vpop.f32.mrf.mxu0 }
  0xc9   :  { %v81_v11 = vmax.f32 %v76_v9, 0.0 }
  0xca   :  { %v78_v12 = vpop.f32.mrf.mxu0 }
  0xcb   :  { %v82_v13 = vpack.c.bf16 %v81_v11, %v81_v11 }
  0xcc   :  { %v349_v14 = vpop.f32.mrf.mxu0 }
  0xcd   :  { %353 = vmatmul.mubr.msk.bf16.vlgmr.msra.gmra.mxu1 %vm96_vm3, %v82_v13 }
  0xce   :  { %372 = vmatprep.mubr.msk.bf16.mxu1 %vm413_vm1, %v412_v2  ;;  %365 = vmatpush3.bf16.msra.mxu1 %v382_v16 }
  0xcf   :  { %366 = vmatprep.subr.bf16.mxu1 %v412_v2 }
  0xd2   :  { %367 = vmatpush3.bf16.msra.mxu1 %v383_v17 }
  0xd3   :  { %368 = vmatprep.subr.bf16.mxu1 %v412_v2 }
  0xd6   :  { %369 = vmatpush3.bf16.msra.mxu1 %v384_v26 }
  0xd7   :  { %370 = vmatprep.subr.bf16.mxu1 %v412_v2 }
  0xda   :  { %371 = vmatpush3.bf16.msra.mxu1 %v385_v27 }
 0x18d   :  { %v134_v19 = vpop.f32.mrf.mxu1 }
 0x18e   :  { %v135_v20 = vadd.f32 %v319_v18, %v134_v19 }
 0x18f   :  { %v354_v21 = vpop.f32.mrf.mxu1 }
 0x190   :  { %v140_v22 = vmax.f32 %v135_v20, 0.0 }
 0x191   :  { %v137_v23 = vpop.f32.mrf.mxu1 }
 0x192   :  { %v141_v24 = vpack.c.bf16 %v140_v22, %v140_v22 }
 0x193   :  { %v355_v25 = vpop.f32.mrf.mxu1 }
 0x194   :  { %361 = vmatmul.mubr.msk.bf16.vlgmr.msra.gmra.mxu0 %vm163_vm4, %v141_v24 }
 0x254   :  { %v201_v29 = vpop.f32.mrf.mxu0 }
 0x255   :  { %v202_v30 = vadd.f32 %v322_v28, %v201_v29 }
 0x256   :  { %v362_v31 = vpop.f32.mrf.mxu0 }
 0x257   :  { %v207_v32 = vmax.f32 %v202_v30, 0.0 }
 0x258   :  { %v204_v33 = vpop.f32.mrf.mxu0 }
 0x259   :  { %v208_v34 = vpack.c.bf16 %v207_v32, %v207_v32 }
 0x25a   :  { %v363_v35 = vpop.f32.mrf.mxu0 }
 0x25b   :  { %373 = vmatmul.mubr.msk.bf16.vlgmr.msra.gmra.mxu1 %vm246_vm5, %v208_v34 }
 0x31b   :  { %v284_v37 = vpop.f32.mrf.mxu1 }
 0x31c   :  { %v285_v38 = vadd.f32 %v326_v36, %v284_v37 }
 0x31d   :  { %v374_v39 = vpop.f32.mrf.mxu1 }
 0x31e   :  { %v291_v40 = vsel %vm290_vm6, %v285_v38, -inf }
 0x31f   :  { %292 = vmax.xlane.f32.xlu0 %v291_v40  ;;  %v287_v41 = vpop.f32.mrf.mxu1 }
 0x321   :  { %v375_v42 = vpop.f32.mrf.mxu1 }
 0x3a8   :  { %v293_v43 = vpop.xlane.xlu0 %292 }
 0x3a9   :  { %v294_v44 = vsub.f32 %v285_v38, %v293_v43 }
 0x3ab   :  { %v295_v45 = vmul.f32 1.442695, %v294_v44 }
 0x3ad   :  { %386 = vpow2.f32 %v295_v45 }
 0x3ba   :  { %v387_v46 = vpop.eup %386 }
 0x3bb   :  { %v297_v47 = vsel %vm290_vm6, %v387_v46, 0.0 }
 0x3bc   :  { %298 = vadd.xlane.f32.xlu0 %v297_v47 }
 0x445   :  { %v299_v48 = vpop.xlane.xlu0 %298 }
 0x446   :  { %388 = vrcp.f32 %v299_v48 }
 0x453   :  { %v389_v49 = vpop.eup %388 }
 0x454   :  { %v301_v50 = vmul.f32 %v389_v49, %v387_v46 }
 0x456   :  { %302 = vst.msk [vmem:[#allocation2] sm:$0xff] %vm290_vm6, %v301_v50 }
 0x457   :  { %401 = shalt.err (!%p398_p4)
}
 0x458   :  { %312 = dma.vmem_to_hbm [thread:$0]  %s310_s5, 128, %s505_s6, [#allocation3]  }
 0x459   :  { %410 = dma.done.wait [#allocation3], 128  }
 0x45a   :  { %411 = vsyncadd [#allocation3], 4294967168 }
 0x45b   :  { %316 = vsyncpa [#allocation3], 1 }

</bundles_post_ra>
